<compile_context>
chip_gen: v7x
topology: tpu7x:2x2x1
jax: 0.10.0
libtpu: 0.0.40
codegen_flags: <defaults>
</compile_context>

<pallas_src>
import jax
import jax.numpy as jnp
from jax.experimental import pallas as pl
from jax.experimental.pallas import tpu as pltpu


def _intepe_kernel(coords_ref, covar_ref, lift_ref, out_ref):
    # coords_ref/covar_ref: [TM, dim]; lift_ref: [dim, L*dim]; out_ref: [TM, 2*L*dim]
    lift = lift_ref[...].astype(jnp.float32)
    c = coords_ref[...].astype(jnp.float32)
    v = covar_ref[...].astype(jnp.float32)

    # coords_lifted[n, l*dim + d] = coords[n, d] * scales[l]   (P has one nonzero/column)
    cl = jnp.dot(c, lift, preferred_element_type=jnp.float32)            # [TM, LD]
    # covar_lifted uses scales**2; elementwise square of P is exact for its layout.
    vl = jnp.dot(v, lift * lift, preferred_element_type=jnp.float32)     # [TM, LD]
    ev = jnp.exp(-0.5 * vl)                                              # [TM, LD]

    # One full-tile store (sin half first, cos half second — same order as the module).
    out = jnp.concatenate([jnp.sin(cl) * ev, jnp.cos(cl) * ev], axis=-1)  # [TM, 2*LD]
    out_ref[...] = out.astype(out_ref.dtype)


def _round_up(x, m):
    return ((x + m - 1) // m) * m


def make_lift_matrix(min_deg, max_deg, dim):
    """P: [dim, L*dim] with P[d, l*dim + d] = scales[l], scales = arange(min_deg, max_deg)."""
    scales = jnp.arange(min_deg, max_deg, dtype=jnp.float32)       # [L]
    eye = jnp.eye(dim, dtype=jnp.float32)                          # [dim, dim]
    lift = eye[:, None, :] * scales[None, :, None]                 # [dim, L, dim]
    return lift.reshape(dim, scales.shape[0] * dim)                # [dim, L*dim]


def inte_pe_pallas(coords, covar, min_deg, max_deg, *, tile_rows=512):
    """coords, covar: [..., dim] -> [..., 2*dim*(max_deg - min_deg)]."""
    assert coords.shape == covar.shape, "coords and covar must share shape [..., dim]"
    lead = coords.shape[:-1]
    dim = coords.shape[-1]
    L = max_deg - min_deg
    LD = L * dim
    out_dim = 2 * LD

    lift = make_lift_matrix(min_deg, max_deg, dim)                 # [dim, LD], f32

    coords2d = coords.reshape(-1, dim)
    covar2d = covar.reshape(-1, dim)
    N = coords2d.shape[0]

    # Large row tiles to reach the HBM roofline; clamp for tiny inputs so we don't
    # DMA a mostly-padded block. Sub-32-bit inputs need 16-row sublane packing.
    row_align = 16 if coords.dtype.itemsize < 4 else 8
    tm = min(_round_up(tile_rows, row_align), _round_up(N, row_align))
    tm = max(tm, row_align)
    grid = (pl.cdiv(N, tm),)   # ragged last block handled by Pallas (no host pad/slice)

    out = pl.pallas_call(
        _intepe_kernel,
        out_shape=jax.ShapeDtypeStruct((N, out_dim), coords.dtype),
        grid_spec=pltpu.PrefetchScalarGridSpec(
            num_scalar_prefetch=0,
            grid=grid,
            in_specs=[
                pl.BlockSpec((tm, dim), lambda i: (i, 0)),
                pl.BlockSpec((tm, dim), lambda i: (i, 0)),
                pl.BlockSpec((dim, LD), lambda i: (0, 0)),   # resident constant block
            ],
            out_specs=pl.BlockSpec((tm, out_dim), lambda i: (i, 0)),
        ),
        compiler_params=pltpu.CompilerParams(
            dimension_semantics=("parallel",),
            vmem_limit_bytes=64 * 1024 * 1024,
        ),
    )(coords2d, covar2d, lift)

    return out.reshape(*lead, out_dim)


def inte_pe_reference(coords, covar, min_deg, max_deg):
    scales = jnp.arange(min_deg, max_deg, dtype=jnp.float32)
    cl = (coords[..., None, :] * scales[:, None]).reshape(*coords.shape[:-1], -1)
    vl = (covar[..., None, :] * (scales[:, None] ** 2)).reshape(*covar.shape[:-1], -1)
    ev = jnp.exp(-0.5 * vl)
    return jnp.concatenate([jnp.sin(cl) * ev, jnp.cos(cl) * ev], axis=-1)


if __name__ == "__main__":
    # Small shapes consistent with the module: coords/covar [bsz, nsmpl, dim=3]
    bsz, nsmpl, dim = 2, 8, 3
    min_deg, max_deg = 0, 16
    pe_dim = 2 * dim * (max_deg - min_deg)   # 96

    key = jax.random.PRNGKey(0)
    k_coords, k_covar = jax.random.split(key)
    coords = jax.random.normal(k_coords, (bsz, nsmpl, dim), dtype=jnp.float32)
    covar = jax.random.uniform(k_covar, (bsz, nsmpl, dim), dtype=jnp.float32) * 0.1

    out = inte_pe_pallas(coords, covar, min_deg, max_deg)
    out = jax.block_until_ready(out)

    ref = inte_pe_reference(coords, covar, min_deg, max_deg)
    assert out.shape == (bsz, nsmpl, pe_dim)
    assert jnp.allclose(out, ref, atol=1e-5, rtol=1e-5)

    print("KERNEL_OK")
</pallas_src>

<mosaic_0001>
module attributes {stable_mosaic.version = 11 : i64} {
  func.func @_intepe_kernel(%arg0: i32, %arg1: memref<16x3xf32, #tpu.memory_space<vmem>>, %arg2: memref<16x3xf32, #tpu.memory_space<vmem>>, %arg3: memref<3x48xf32, #tpu.memory_space<vmem>>, %arg4: memref<16x96xf32, #tpu.memory_space<vmem>>) attributes {dimension_semantics = [#tpu.dimension_semantics<parallel>], iteration_bounds = array<i64: 1>, scalar_prefetch = 0 : i64, scratch_operands = 0 : i64, tpu.core_type = #tpu.core_type<tc>, window_params = [{transform_indices = @transform_0, window_bounds = array<i64: 16, 3>}, {transform_indices = @transform_1, window_bounds = array<i64: 16, 3>}, {pipeline_mode = #tpu.pipeline_mode<synchronous>, transform_indices = @transform_2, window_bounds = array<i64: 3, 48>}, {transform_indices = @transform_3, window_bounds = array<i64: 16, 96>}]} {
    %c0 = arith.constant 0 : index
    %c0_0 = arith.constant 0 : index
    %0 = vector.load %arg3[%c0, %c0_0] : memref<3x48xf32, #tpu.memory_space<vmem>>, vector<3x48xf32>
    %c0_1 = arith.constant 0 : index
    %c0_2 = arith.constant 0 : index
    %1 = vector.load %arg1[%c0_1, %c0_2] : memref<16x3xf32, #tpu.memory_space<vmem>>, vector<16x3xf32>
    %c0_3 = arith.constant 0 : index
    %c0_4 = arith.constant 0 : index
    %2 = vector.load %arg2[%c0_3, %c0_4] : memref<16x3xf32, #tpu.memory_space<vmem>>, vector<16x3xf32>
    %cst = arith.constant dense<0.000000e+00> : vector<16x48xf32>
    %3 = tpu.matmul %1, %0, %cst {dimension_numbers = #tpu.dot_dimension_numbers<[1], [0], [0], [1], [0, 0, 1, 1], [], []>} : vector<16x3xf32>, vector<3x48xf32>, vector<16x48xf32> -> vector<16x48xf32>
    %4 = arith.mulf %0, %0 : vector<3x48xf32>
    %cst_5 = arith.constant dense<0.000000e+00> : vector<16x48xf32>
    %5 = tpu.matmul %2, %4, %cst_5 {dimension_numbers = #tpu.dot_dimension_numbers<[1], [0], [0], [1], [0, 0, 1, 1], [], []>} : vector<16x3xf32>, vector<3x48xf32>, vector<16x48xf32> -> vector<16x48xf32>
    %cst_6 = arith.constant -5.000000e-01 : f32
    %6 = vector.broadcast %cst_6 : f32 to vector<16x48xf32>
    %7 = arith.mulf %6, %5 : vector<16x48xf32>
    %8 = math.exp %7 : vector<16x48xf32>
    %9 = math.sin %3 : vector<16x48xf32>
    %10 = arith.mulf %9, %8 : vector<16x48xf32>
    %11 = math.cos %3 : vector<16x48xf32>
    %12 = arith.mulf %11, %8 : vector<16x48xf32>
    %13 = tpu.concatenate %10, %12 in 1 : vector<16x48xf32>, vector<16x48xf32> -> vector<16x96xf32>
    %c0_7 = arith.constant 0 : index
    %c0_8 = arith.constant 0 : index
    %14 = vector.load %arg4[%c0_7, %c0_8] : memref<16x96xf32, #tpu.memory_space<vmem>>, vector<16x96xf32>
    tpu.vector_store %arg4[%c0_7, %c0_8], %13 {strides = array<i32>} : memref<16x96xf32, #tpu.memory_space<vmem>>, vector<16x96xf32>,
    return
  }
  func.func @transform_0(%arg0: i32) -> (i32, i32) {
    %c0_i32 = arith.constant 0 : i32
    %c0_i32_0 = arith.constant 0 : i32
    return %arg0, %c0_i32 : i32, i32
  }
  func.func @transform_1(%arg0: i32) -> (i32, i32) {
    %c0_i32 = arith.constant 0 : i32
    %c0_i32_0 = arith.constant 0 : i32
    return %arg0, %c0_i32 : i32, i32
  }
  func.func @transform_2(%arg0: i32) -> (i32, i32) {
    %c0_i32 = arith.constant 0 : i32
    %c0_i32_0 = arith.constant 0 : i32
    %c0_i32_1 = arith.constant 0 : i32
    return %c0_i32, %c0_i32_0 : i32, i32
  }
  func.func @transform_3(%arg0: i32) -> (i32, i32) {
    %c0_i32 = arith.constant 0 : i32
    %c0_i32_0 = arith.constant 0 : i32
    return %arg0, %c0_i32 : i32, i32
  }
}

</mosaic_0001>

<bundles_post_ra>
// kernel: tpu_custom_call.1
= control target key start
LH: loop header
LB: loop body
LE: loop exit
PB: predicated region body
PF: predicated region fallthrough
CT: control target
= control target key end

     0   :  { %8 = vsyncpa [#allocation3], 0  ;;  %s1016_s0 = inlined_call_operand.hbm [shape: f32[16,3], index: 0, kind: input, shape index: {}]   ;;  %s1017_s1 = inlined_call_operand.hbm [shape: f32[16,3], index: 1, kind: input, shape index: {}]   ;;  %s1018_s2 = inlined_call_operand.hbm [shape: f32[3,48], index: 2, kind: input, shape index: {}]   ;;  %s1019_s3 = inlined_call_operand.hbm [shape: f32[16,96], index: 3, kind: output, shape index: {}]  }
   0x1   :  { %9 = vsyncpa [#allocation6], 0 }
   0x2   :  { %10 = vsyncpa [#allocation4], 0  ;;  %s851_s12 = smov [#allocation5]   ;;  %s852_s14 = smov [#allocation2]  }
   0x3   :  { %s28_s13 = sshll.u32 %s851_s12, 4  ;;  %s16_s15 = sshll.u32 %s852_s14, 4  ;;  %s29_s13 = int_to_ptr.vmem [resolvable:$true] %s28_s13  ;;  %s884_s15 = int_to_ptr.vmem [resolvable:$true] %s16_s15 }
   0x4   :  { %s757_s18 = scalar_lea.hbm %s1017_s1, 256 }
   0x5   :  { %p758_p0 = scmp.ne.s32.totalorder %s1017_s1, %s757_s18  ;;  %p761_p1 = scmp.lt.u32.totalorder %s757_s18, %s1017_s1 }
   0x7   :  { %p763_p2 = pnand %p761_p1, %p758_p0 }
   0x9   :  { %766 = shalt.err (!%p763_p2)
}
   0xa   :  { %s767_s23 = scalar_lea.vmem %s29_s13, 256  ;;  %p772_p4 = scmp.lt.s32.totalorder %s29_s13, %s29_s13 }
   0xb   :  { %p768_p3 = scmp.ne.s32.totalorder %s29_s13, %s767_s23  ;;  %p773_p5 = scmp.lt.s32.totalorder %s767_s23, %s767_s23 }
   0xd   :  { %p774_p6 = por %p773_p5, %p772_p4 }
   0xf   :  { %p775_p7 = pnand %p774_p6, %p768_p3 }
  0x11   :  { %778 = shalt.err (!%p775_p7)
}
  0x12   :  { %s853_s24 = smov 128   ;;  %s854_s25 = smov 8  }
  0x13   :  { %34 = dma.hbm_to_vmem [thread:$0]  %s1017_s1, 256, %s29_s13, [#allocation6], %s853_s24, %s853_s24, %s854_s25  }
  0x14   :  { %s779_s30 = scalar_lea.hbm %s1016_s0, 256 }
  0x15   :  { %p780_p8 = scmp.ne.s32.totalorder %s1016_s0, %s779_s30  ;;  %p783_p9 = scmp.lt.u32.totalorder %s779_s30, %s1016_s0 }
  0x17   :  { %p785_p10 = pnand %p783_p9, %p780_p8 }
  0x19   :  { %788 = shalt.err (!%p785_p10)
}
  0x1a   :  { %s789_s8 = scalar_lea.vmem %s884_s15, 256  ;;  %p794_p12 = scmp.lt.s32.totalorder %s884_s15, %s884_s15 }
  0x1b   :  { %p790_p11 = scmp.ne.s32.totalorder %s884_s15, %s789_s8  ;;  %p795_p13 = scmp.lt.s32.totalorder %s789_s8, %s789_s8 }
  0x1d   :  { %p796_p0 = por %p795_p13, %p794_p12 }
  0x1f   :  { %p797_p1 = pnand %p796_p0, %p790_p11 }
  0x21   :  { %800 = shalt.err (!%p797_p1)
}
  0x22   :  { %22 = dma.hbm_to_vmem [thread:$0]  %s1016_s0, 256, %s884_s15, [#allocation3], %s853_s24, %s853_s24, %s854_s25  }
  0x23   :  { %s855_s10 = smov [#allocation7]   ;;  %s801_s14 = scalar_lea.hbm %s1018_s2, 64 }
  0x24   :  { %s41_s11 = sshll.u32 %s855_s10, 4  ;;  %p802_p2 = scmp.ne.s32.totalorder %s1018_s2, %s801_s14  ;;  %s42_s11 = int_to_ptr.vmem [resolvable:$true] %s41_s11 }
  0x25   :  { %p805_p3 = scmp.lt.u32.totalorder %s801_s14, %s1018_s2 }
  0x27   :  { %p807_p4 = pnand %p805_p3, %p802_p2 }
  0x29   :  { %810 = shalt.err (!%p807_p4)
}
  0x2a   :  { %s811_s20 = scalar_lea.vmem %s42_s11, 64  ;;  %p816_p6 = scmp.lt.s32.totalorder %s42_s11, %s42_s11 }
  0x2b   :  { %p812_p5 = scmp.ne.s32.totalorder %s42_s11, %s811_s20  ;;  %p817_p7 = scmp.lt.s32.totalorder %s811_s20, %s811_s20 }
  0x2d   :  { %p818_p8 = por %p817_p7, %p816_p6 }
  0x2f   :  { %p819_p9 = pnand %p818_p8, %p812_p5 }
  0x31   :  { %822 = shalt.err (!%p819_p9)
}
  0x32   :  { %44 = dma.hbm_to_vmem [thread:$0]  %s1018_s2, 64, %s42_s11, [#allocation6]  }
  0x33   :  { %845 = dma.done.wait [#allocation3], 256  }
  0x34   :  { %846 = vsyncadd [#allocation3], 4294967040 }
  0x35   :  { %847 = dma.done.wait [#allocation6], 320  }
  0x36   :  { %848 = vsyncadd [#allocation6], 4294966976  ;;  %vm66_vm0 = vcmask 1042432   ;;  %vm59_vm1 = vcmask 23552   ;;  %v54_v0 = vld [vmem:[#allocation7] sm:$0x7] }
  0x37   :  { %v55_v1 = vld [vmem:[#allocation2] sm:$0xff]  ;;  %v56_v2 = vld [vmem:[#allocation2 + $0x8] sm:$0xff]  ;;  %714 = vmatprep.subr.msk.mxu0 %vm66_vm0, %v54_v0  ;;  %v145_v3 = vmul.f32 %v54_v0, %v54_v0  ;;  %v57_v4 = vld [vmem:[#allocation5] sm:$0xff]  ;;  %v856_v30 = vmov 683565275   ;;  %s862_s2 = smov 48  }
  0x38   :  { %716 = vmatprep.mubr.msk.f32.mxu0 %vm59_vm1, %v55_v1  ;;  %715 = vmatpush3.msk.msra.mxu0 %vm66_vm0, %v54_v0  ;;  %v58_v5 = vld [vmem:[#allocation5 + $0x8] sm:$0xff]  ;;  %v857_v34 = vmov 2475754826   ;;  %v858_v36 = vmov 2131351028   ;;  %s863_s21 = smov [#allocation8]  }
  0x39   :  { %721 = vmatprep.mubr.msk.f32.mxu1 %vm59_vm1, %v57_v4  ;;  %717 = vmatmul.mubr.msk.f32.vlgmr.msra.gmra.mrb[0].mxu0 %vm59_vm1, %v56_v2  ;;  %v859_v38 = vmov 2102212464   ;;  %v860_v40 = vmov 920167782   ;;  %v861_v47 = vmov 1326507024  }
  0x3a   :  { %719 = vmatprep.subr.msk.mxu1 %vm66_vm0, %v145_v3  ;;  %s673_s22 = sshll.u32 %s863_s21, 4  ;;  %s674_s22 = int_to_ptr.vmem [resolvable:$true] %s673_s22 }
  0x3b   :  { %720 = vmatpush3.msk.msra.mxu1 %vm66_vm0, %v145_v3  ;;  %s823_s23 = scalar_lea.vmem %s674_s22, 256  ;;  %p828_p11 = scmp.lt.s32.totalorder %s674_s22, %s674_s22 }
  0x3c   :  { %722 = vmatmul.mubr.msk.f32.vlgmr.msra.gmra.mrb[0].mxu1 %vm59_vm1, %v58_v5  ;;  %p824_p10 = scmp.ne.s32.totalorder %s674_s22, %s823_s23  ;;  %p829_p12 = scmp.lt.s32.totalorder %s823_s23, %s823_s23 }
  0x3e   :  { %p830_p13 = por %p829_p12, %p828_p11 }
  0x40   :  { %p831_p0 = pnand %p830_p13, %p824_p10 }
 0x10c   :  { %v933_v6 = vpop.f32.mrb[0].mxu0 }
 0x10d   :  { %v340_v7 = vand.u32 2147483647, %v933_v6  ;;  %v343_v8 = vand.u32 2139095040, %v933_v6  ;;  %v937_v9 = vpop.f32.mrb[1].mxu0  ;;  %vm342_vm0 = vcmp.lt.s32.totalorder %v933_v6, 0 }
 0x10e   :  { %v239_v10 = vand.u32 2139095040, %v937_v9  ;;  %v236_v14 = vand.u32 2147483647, %v937_v9 }
 0x10f   :  { %v940_v11 = vpop.f32.mrb[0].mxu1  ;;  %v344_v12 = vshrl.u32 %v343_v8, 23  ;;  %v347_v13 = vand.u32 8388607, %v340_v7  ;;  %vm341_vm1 = vcmp.le.f32.partialorder %v340_v7, 0.7853982 }
 0x110   :  { %v240_v15 = vshrl.u32 %v239_v10, 23  ;;  %v945_v16 = vpop.f32.mrb[1].mxu1  ;;  %v949_v21 = vand.u32 8388607, %v236_v14 }
 0x111   :  { %v696_v17 = vadd.s32 4294967169, %v344_v12  ;;  %v348_v20 = vor.u32 8388608, %v347_v13 }
 0x112   :  { %v692_v18 = vadd.s32 4294967169, %v240_v15  ;;  %v244_v28 = vor.u32 8388608, %v949_v21 }
 0x113   :  { %v350_v19 = vadd.s32 1, %v696_v17  ;;  %v951_v27 = vshll.u32 %v348_v20, 8 }
 0x114   :  { %v246_v22 = vadd.s32 1, %v692_v18 }
 0x115   :  { %vm351_vm2 = vcmp.gt.s32.totalorder %v350_v19, 0 }
 0x116   :  { %v352_v23 = vsel %vm351_vm2, %v350_v19, 0  ;;  %vm247_vm3 = vcmp.gt.s32.totalorder %v246_v22, 0  ;;  %vm238_vm2 = vcmp.lt.s32.totalorder %v937_v9, 0 }
 0x117   :  { %v353_v24 = vshrl.u32 %v352_v23, 5  ;;  %v354_v25 = vand.u32 31, %v352_v23  ;;  %v248_v26 = vsel %vm247_vm3, %v246_v22, 0  ;;  %vm237_vm3 = vcmp.le.f32.partialorder %v236_v14, 0.7853982 }
 0x118   :  { %v954_v32 = vshrl.u32 %v248_v26, 5  ;;  %v250_v33 = vand.u32 31, %v248_v26 }
 0x119   :  { %v355_v29 = vsub.s32 32, %v354_v25  ;;  %v357_v31 = vshll.u32 %v856_v30, %v354_v25  ;;  %v360_v35 = vshll.u32 %v857_v34, %v354_v25  ;;  %v363_v37 = vshll.u32 %v858_v36, %v354_v25 }
 0x11a   :  { %v366_v39 = vshll.u32 %v859_v38, %v354_v25  ;;  %v369_v41 = vshll.u32 %v860_v40, %v354_v25  ;;  %vm372_vm4 = vcmp.lt.s32.totalorder %v353_v24, 1  ;;  %vm373_vm5 = vcmp.lt.s32.totalorder %v353_v24, 2 }
 0x11b   :  { %v358_v42 = vshrl.u32 %v857_v34, %v355_v29  ;;  %v361_v43 = vshrl.u32 %v858_v36, %v355_v29  ;;  %v364_v44 = vshrl.u32 %v859_v38, %v355_v29  ;;  %v356_v45 = vshrl.u32 %v856_v30, %v355_v29 }
 0x11c   :  { %v367_v46 = vshrl.u32 %v860_v40, %v355_v29  ;;  %v370_v48 = vshrl.u32 %v861_v47, %v355_v29  ;;  %v251_v52 = vsub.s32 32, %v250_v33  ;;  %vm374_vm6 = vcmp.lt.s32.totalorder %v353_v24, 3 }
 0x11d   :  { %v359_v49 = vor.u32 %v358_v42, %v357_v31  ;;  %v362_v50 = vor.u32 %v361_v43, %v360_v35  ;;  %v365_v51 = vor.u32 %v364_v44, %v363_v37  ;;  %vm375_vm7 = vcmp.lt.s32.totalorder %v353_v24, 4 }
 0x11e   :  { %v368_v53 = vor.u32 %v367_v46, %v366_v39  ;;  %v371_v54 = vor.u32 %v370_v48, %v369_v41  ;;  %v253_v62 = vshll.u32 %v856_v30, %v250_v33  ;;  %v254_v1 = vshrl.u32 %v857_v34, %v251_v52 }
 0x11f   :  { %v376_v55 = vsel %vm372_vm4, %v356_v45, %v359_v49  ;;  %v377_v56 = vsel %vm375_vm7, %v365_v51, 2102212464  ;;  %v380_v57 = vsel %vm372_vm4, %v359_v49, %v362_v50  ;;  %v384_v58 = vsel %vm372_vm4, %v362_v50, %v365_v51 }
 0x120   :  { %v378_v59 = vsel %vm374_vm6, %v362_v50, %v377_v56  ;;  %v381_v60 = vsel %vm375_vm7, %v368_v53, 920167782  ;;  %v385_v61 = vsel %vm375_vm7, %v371_v54, 1326507024  ;;  %v256_v2 = vshll.u32 %v857_v34, %v250_v33 }
 0x121   :  { %v382_v63 = vsel %vm374_vm6, %v365_v51, %v381_v60  ;;  %v386_v0 = vsel %vm374_vm6, %v368_v53, %v385_v61  ;;  %v379_v3 = vsel %vm373_vm5, %v376_v55, %v378_v59  ;;  %v257_v8 = vshrl.u32 %v858_v36, %v251_v52 }
 0x122   :  { %v383_v4 = vsel %vm373_vm5, %v380_v57, %v382_v63  ;;  %v387_v5 = vsel %vm373_vm5, %v384_v58, %v386_v0  ;;  %v255_v17 = vor.u32 %v254_v1, %v253_v62  ;;  %v259_v19 = vshll.u32 %v858_v36, %v250_v33 }
 0x123   :  { %v963_v10 = vmul.u32.u64.low %v951_v27, %v387_v5  ;;  %v964_v12 = vmul.u32.u64.high %v951_v27, %v387_v5, %v963_v10  ;;  %v967_v13 = vmul.u32.u64.low %v951_v27, %v383_v4  ;;  %v968_v15 = vmul.u32.u64.high %v951_v27, %v383_v4, %v967_v13 }
 0x124   :  { %v258_v18 = vor.u32 %v257_v8, %v256_v2  ;;  %v260_v20 = vshrl.u32 %v859_v38, %v251_v52  ;;  %v262_v21 = vshll.u32 %v859_v38, %v250_v33  ;;  %v263_v22 = vshrl.u32 %v860_v40, %v251_v52 }
 0x125   :  { %v266_v23 = vshrl.u32 %v861_v47, %v251_v52  ;;  %v284_v25 = vshll.u32 %v244_v28, 8  ;;  %v395_v24 = vmul.u32 %v951_v27, %v379_v3  ;;  %v252_v26 = vshrl.u32 %v856_v30, %v251_v52 }
 0x126   :  { %v261_v29 = vor.u32 %v260_v20, %v259_v19  ;;  %v265_v31 = vshll.u32 %v860_v40, %v250_v33  ;;  %vm397_vm8 = vc.u32 %v964_v12, %v967_v13  ;;  %v398_v34 = vadd.s32 1, %v968_v15 }
 0x127   :  { %v264_v35 = vor.u32 %v263_v22, %v262_v21  ;;  %vm268_vm9 = vcmp.lt.s32.totalorder %v954_v32, 1  ;;  %vm270_vm10 = vcmp.lt.s32.totalorder %v954_v32, 3  ;;  %vm271_vm11 = vcmp.lt.s32.totalorder %v954_v32, 4 }
 0x128   :  { %v267_v37 = vor.u32 %v266_v23, %v265_v31  ;;  %v276_v36 = vsel %vm268_vm9, %v255_v17, %v258_v18  ;;  %v399_v28 = vsel %vm397_vm8, %v398_v34, %v968_v15  ;;  %v273_v38 = vsel %vm271_vm11, %v261_v29, 2102212464 }
 0x129   :  { %v277_v27 = vsel %vm271_vm11, %v264_v35, 920167782  ;;  %v280_v30 = vsel %vm268_vm9, %v258_v18, %v261_v29  ;;  %v400_v39 = vadd.s32 %v399_v28, %v395_v24  ;;  %vm269_vm12 = vcmp.lt.s32.totalorder %v954_v32, 2 }
 0x12a   :  { %v278_v33 = vsel %vm270_vm10, %v261_v29, %v277_v27  ;;  %v281_v40 = vsel %vm271_vm11, %v267_v37, 1326507024  ;;  %v272_v41 = vsel %vm268_vm9, %v252_v26, %v255_v17  ;;  %v274_v42 = vsel %vm270_vm10, %v258_v18, %v273_v38 }
 0x12b   :  { %v279_v43 = vsel %vm269_vm12, %v276_v36, %v278_v33  ;;  %v282_v44 = vsel %vm270_vm10, %v264_v35, %v281_v40  ;;  %v401_v45 = vadd.s32 536870912, %v400_v39  ;;  %v275_v52 = vsel %vm269_vm12, %v272_v41, %v274_v42 }
 0x12c   :  { %v283_v46 = vsel %vm269_vm12, %v280_v30, %v282_v44  ;;  %v978_v47 = vmul.u32.u64.low %v284_v25, %v279_v43  ;;  %v979_v48 = vmul.u32.u64.high %v284_v25, %v279_v43, %v978_v47  ;;  %v291_v32 = vmul.u32 %v284_v25, %v275_v52 }
 0x12d   :  { %v981_v49 = vmul.u32.u64.low %v284_v25, %v283_v46  ;;  %v982_v50 = vmul.u32.u64.high %v284_v25, %v283_v46, %v981_v49  ;;  %v402_v51 = vshrl.u32 %v401_v45, 30  ;;  %v396_v4 = vadd.s32 %v967_v13, %v964_v12 }
 0x12e   :  { %v294_v54 = vadd.s32 1, %v979_v48  ;;  %v231_v38 = vmul.f32 -0.5, %v940_v11  ;;  %vm432_vm10 = vweird.f32 %v933_v6 }
 0x12f   :  { %v403_v53 = vshll.u32 %v402_v51, 30  ;;  %vm293_vm13 = vc.u32 %v982_v50, %v978_v47  ;;  %v292_v29 = vadd.s32 %v978_v47, %v982_v50  ;;  %v426_v13 = vsub.s32 4, %v402_v51 }
 0x130   :  { %v295_v56 = vsel %vm293_vm13, %v294_v54, %v979_v48  ;;  %v234_v42 = vmul.f32 1.442695, %v231_v38  ;;  %v230_v47 = vmul.f32 -0.5, %v945_v16 }
 0x131   :  { %v404_v55 = vsub.s32 %v400_v39, %v403_v53  ;;  %v296_v57 = vadd.s32 %v295_v56, %v291_v32  ;;  %v427_v33 = vsel %vm342_vm0, %v426_v13, %v402_v51 }
 0x132   :  { %v429_v43 = vsel %vm341_vm1, 0, %v427_v33  ;;  %v232_v51 = vmul.f32 1.442695, %v230_v47 }
 0x133   :  { %v406_v58 = vsub.s32 0, %v404_v55  ;;  %v297_v59 = vadd.s32 536870912, %v296_v57  ;;  %v433_v48 = vadd.s32 3, %v429_v43  ;;  %v642_v53 = vand.u32 3, %v429_v43 }
 0x135   :  { %v697_v60 = vmin.u32 %v406_v58, %v404_v55  ;;  %v298_v61 = vshrl.u32 %v297_v59, 30  ;;  %v434_v52 = vand.u32 3, %v433_v48  ;;  %vm644_vm5 = vcmp.eq.s32.totalorder %v642_v53, 0 }
 0x136   :  { %vm647_vm6 = vcmp.eq.s32.totalorder %v642_v53, 2  ;;  %vm643_vm9 = vcmp.lt.s32.totalorder %v642_v53, 2 }
 0x137   :  { %v408_v62 = vclz %v697_v60  ;;  %v299_v63 = vshll.u32 %v298_v61, 30  ;;  %v322_v11 = vsub.s32 4, %v298_v61  ;;  %vm439_vm4 = vcmp.eq.s32.totalorder %v434_v52, 2 }
 0x138   :  { %vm436_vm7 = vcmp.eq.s32.totalorder %v434_v52, 0  ;;  %vm435_vm8 = vcmp.lt.s32.totalorder %v434_v52, 2 }
 0x139   :  { %v698_v0 = vadd.s32 4294967294, %v408_v62  ;;  %v300_v1 = vsub.s32 %v296_v57, %v299_v63  ;;  %v323_v50 = vsel %vm238_vm2, %v322_v11, %v298_v61 }
 0x13b   :  { %vm699_vm14 = vcmp.lt.s32.totalorder %v698_v0, 0  ;;  %v302_v3 = vsub.s32 0, %v300_v1 }
 0x13c   :  { %v411_v2 = vsel %vm699_vm14, 0, %v698_v0 }
 0x13d   :  { %v412_v5 = vsub.s32 32, %v411_v2  ;;  %v416_v8 = vsub.s32 4294967266, %v411_v2  ;;  %v693_v10 = vmin.u32 %v302_v3, %v300_v1  ;;  %v413_v15 = vshll.u32 %v404_v55, %v411_v2 }
 0x13e   :  { %v325_v55 = vsel %vm237_vm3, 0, %v323_v50 }
 0x13f   :  { %v414_v17 = vshrl.u32 %v396_v4, %v412_v5  ;;  %v417_v18 = vadd.s32 127, %v416_v8  ;;  %v304_v19 = vclz %v693_v10  ;;  %v329_v58 = vadd.s32 3, %v325_v55 }
 0x140   :  { %v539_v4 = vand.u32 3, %v325_v55 }
 0x141   :  { %v415_v20 = vor.u32 %v414_v17, %v413_v15  ;;  %v418_v21 = vshll.u32 %v417_v18, 23  ;;  %v694_v22 = vadd.s32 4294967294, %v304_v19  ;;  %v330_v3 = vand.u32 3, %v329_v58 }
 0x142   :  { %vm544_vm12 = vcmp.eq.s32.totalorder %v539_v4, 2  ;;  %vm541_vm14 = vcmp.eq.s32.totalorder %v539_v4, 0 }
 0x143   :  { %v419_v23 = vor.u32 4788187, %v418_v21  ;;  %vm695_vm15 = vcmp.lt.s32.totalorder %v694_v22, 0  ;;  %v422_v24 = vcvt.s32.f32 %v415_v20  ;;  %vm335_vm11 = vcmp.eq.s32.totalorder %v330_v3, 2 }
 0x144   :  { %v307_v26 = vsel %vm695_vm15, 0, %v694_v22  ;;  %vm332_vm13 = vcmp.eq.s32.totalorder %v330_v3, 0  ;;  %vm331_vm15 = vcmp.lt.s32.totalorder %v330_v3, 2 }
 0x145   :  { %v420_v25 = vand.u32 2147483647, %v419_v23  ;;  %v308_v31 = vsub.s32 32, %v307_v26  ;;  %v312_v34 = vsub.s32 4294967266, %v307_v26  ;;  %v309_v35 = vshll.u32 %v300_v1, %v307_v26 }
 0x147   :  { %v423_v12 = vmul.f32 %v422_v24, %v420_v25  ;;  %v310_v37 = vshrl.u32 %v292_v29, %v308_v31  ;;  %v313_v36 = vadd.s32 127, %v312_v34 }
 0x149   :  { %v424_v28 = vxor.u32 2147483648, %v423_v12  ;;  %v311_v27 = vor.u32 %v310_v37, %v309_v35  ;;  %v314_v30 = vshll.u32 %v313_v36, 23 }
 0x14b   :  { %v425_v39 = vsel %vm342_vm0, %v424_v28, %v423_v12  ;;  %v315_v41 = vor.u32 4788187, %v314_v30  ;;  %v318_v45 = vcvt.s32.f32 %v311_v27  ;;  %vm540_vm0 = vcmp.lt.s32.totalorder %v539_v4, 2 }
 0x14c   :  { %v428_v40 = vsel %vm341_vm1, %v933_v6, %v425_v39  ;;  %vm328_vm1 = vweird.f32 %v937_v9 }
 0x14d   :  { %745 = vcosq.f32 %v428_v40  ;;  %v316_v44 = vand.u32 2147483647, %v315_v41 }
 0x14e   :  { %747 = vsinq.f32 %v428_v40 }
 0x14f   :  { %v319_v46 = vmul.f32 %v318_v45, %v316_v44  ;;  %749 = vpow2.f32 %v234_v42 }
 0x151   :  { %v320_v49 = vxor.u32 2147483648, %v319_v46 }
 0x153   :  { %v321_v7 = vsel %vm238_vm2, %v320_v49, %v319_v46  ;;  %vm662_vm2 = vcmask 392192  }
 0x154   :  { %v324_v54 = vsel %vm237_vm3, %v937_v9, %v321_v7  ;;  %vm665_vm3 = vcmask 785408  }
 0x155   :  { %751 = vcosq.f32 %v324_v54 }
 0x156   :  { %753 = vsinq.f32 %v324_v54 }
 0x157   :  { %v746_v32 = vpop.eup %745  ;;  %755 = vpow2.f32 %v232_v51 }
 0x158   :  { %v748_v16 = vpop.eup %747  ;;  %v440_v56 = vxor.u32 2147483648, %v746_v32 }
 0x159   :  { %v437_v57 = vxor.u32 2147483648, %v748_v16  ;;  %v750_v60 = vpop.eup %749 }
 0x15a   :  { %v441_v14 = vsel %vm439_vm4, %v440_v56, %v748_v16  ;;  %v649_v59 = vsel %vm647_vm6, %v440_v56, %v748_v16 }
 0x15b   :  { %v438_v61 = vsel %vm436_vm7, %v746_v32, %v437_v57  ;;  %v646_v62 = vsel %vm644_vm5, %v746_v32, %v437_v57 }
 0x15c   :  { %v442_v63 = vsel %vm435_vm8, %v438_v61, %v441_v14  ;;  %v650_v0 = vsel %vm643_vm9, %v646_v62, %v649_v59 }
 0x15d   :  { %v443_v1 = vsel %vm432_vm10, nan, %v442_v63  ;;  %v651_v2 = vsel %vm432_vm10, nan, %v650_v0 }
 0x15e   :  { %v653_v5 = vmul.f32 %v750_v60, %v651_v2  ;;  %v445_v8 = vmul.f32 %v750_v60, %v443_v1 }
 0x15f   :  { %v752_v10 = vpop.eup %751 }
 0x160   :  { %v754_v15 = vpop.eup %753  ;;  %v336_v17 = vxor.u32 2147483648, %v752_v10 }
 0x161   :  { %v756_v18 = vpop.eup %755  ;;  %v333_v19 = vxor.u32 2147483648, %v754_v15 }
 0x162   :  { %v546_v20 = vsel %vm544_vm12, %v336_v17, %v754_v15  ;;  %v337_v21 = vsel %vm335_vm11, %v336_v17, %v754_v15 }
 0x163   :  { %v543_v6 = vsel %vm541_vm14, %v752_v10, %v333_v19  ;;  %v334_v22 = vsel %vm332_vm13, %v752_v10, %v333_v19 }
 0x164   :  { %v547_v23 = vsel %vm540_vm0, %v543_v6, %v546_v20  ;;  %v338_v25 = vsel %vm331_vm15, %v334_v22, %v337_v21 }
 0x165   :  { %v548_v24 = vsel %vm328_vm1, nan, %v547_v23  ;;  %v339_v26 = vsel %vm328_vm1, nan, %v338_v25 }
 0x166   :  { %v652_v29 = vmul.f32 %v756_v18, %v548_v24  ;;  %v444_v31 = vmul.f32 %v756_v18, %v339_v26 }
 0x168   :  { %656 = vrot.lane.b32.xlu0 %v652_v29, %s862_s2 }
 0x16c   :  { %658 = vrot.lane.b32.xlu0 %v653_v5, %s862_s2 }
 0x1da   :  { %v657_v34 = vpop.permute.xlu0 %656 }
 0x1db   :  { %v663_v12 = vsel %vm662_vm2, %v444_v31, %v657_v34 }
 0x1dc   :  { %666 = vst.msk [vmem:[#allocation8] sm:$0xff] %vm665_vm3, %v663_v12 }
 0x1de   :  { %v659_v13 = vpop.permute.xlu0 %658 }
 0x1df   :  { %v664_v35 = vsel %vm662_vm2, %v445_v8, %v659_v13 }
 0x1e0   :  { %667 = vst.msk [vmem:[#allocation8 + $0x8] sm:$0xff] %vm665_vm3, %v664_v35 }
 0x1e1   :  { %834 = shalt.err (!%p831_p0)
}
 0x1e2   :  { %s835_s28 = scalar_lea.hbm %s1019_s3, 256 }
 0x1e3   :  { %p836_p1 = scmp.ne.s32.totalorder %s1019_s3, %s835_s28  ;;  %p839_p2 = scmp.lt.u32.totalorder %s835_s28, %s1019_s3 }
 0x1e5   :  { %p841_p3 = pnand %p839_p2, %p836_p1 }
 0x1e7   :  { %844 = shalt.err (!%p841_p3)
}
 0x1e8   :  { %679 = dma.vmem_to_hbm [thread:$0]  %s674_s22, 256, %s1019_s3, [#allocation4], %s853_s24, %s853_s24, %s854_s25  }
 0x1e9   :  { %849 = dma.done.wait [#allocation4], 256  }
 0x1ea   :  { %850 = vsyncadd [#allocation4], 4294967040 }
 0x1eb   :  { %683 = vsyncpa [#allocation3], 1 }
 0x1ec   :  { %684 = vsyncpa [#allocation6], 1 }
 0x1ed   :  { %685 = vsyncpa [#allocation4], 1 }

</bundles_post_ra>
